<compile_context>
chip_gen: v7x
topology: tpu7x:2x2x1
jax: 0.10.0
libtpu: 0.0.40
codegen_flags: <defaults>
</compile_context>

<pallas_src>
import functools
import numpy as np
import jax
import jax.numpy as jnp
from jax.experimental import pallas as pl
from jax.experimental.pallas import tpu as pltpu


# ----------------------------------------------------------------------------
# Small in-kernel helpers
# ----------------------------------------------------------------------------

def _ln_math(x, g, b, eps):
    mu = jnp.mean(x, axis=-1, keepdims=True)
    var = jnp.mean(jnp.square(x - mu), axis=-1, keepdims=True)
    return (x - mu) * jax.lax.rsqrt(var + eps) * g + b


def _row_tile(M):
    # Bigger tiles amortize the ~600-cycle per-grid-step cost; at realistic
    # CLIP-L shapes a 256-512 row tile keeps us near HBM roofline while
    # staying inside the v7x scoped-VMEM budget.
    return M if M <= 512 else 256


# ----------------------------------------------------------------------------
# Pallas kernels
# ----------------------------------------------------------------------------

def _linear_kernel(x_ref, w_ref, b_ref, o_ref, *, activation):
    y = jnp.dot(x_ref[...], w_ref[...], preferred_element_type=jnp.float32)
    y = y + b_ref[...]
    if activation == "quick_gelu":          # HF CLIP-ViT activation
        y = y * jax.nn.sigmoid(1.702 * y)
    elif activation == "gelu":
        # TODO(synk): BLIP-2 QFormer uses exact erf-GELU; tanh approximation is
        # used here for robust Mosaic lowering (difference ~1e-3).
        y = jax.nn.gelu(y, approximate=True)
    o_ref[...] = y.astype(o_ref.dtype)


def pallas_linear(x, w, b, activation=None):
    """x: (M, K); w: (K, N); b: (N,).  y = act(x @ w + b)."""
    M, K = x.shape
    N = w.shape[1]
    TM = _row_tile(M)
    grid = (pl.cdiv(M, TM),)
    # TODO(synk): for very large (K, N) weights an N grid axis should be added
    # to bound weight residency (not needed at these shapes).
    return pl.pallas_call(
        functools.partial(_linear_kernel, activation=activation),
        out_shape=jax.ShapeDtypeStruct((M, N), x.dtype),
        grid=grid,
        in_specs=[pl.BlockSpec((TM, K), lambda i: (i, 0)),
                  pl.BlockSpec((K, N), lambda i: (0, 0)),
                  pl.BlockSpec((1, N), lambda i: (0, 0))],
        out_specs=pl.BlockSpec((TM, N), lambda i: (i, 0)),
        compiler_params=pltpu.CompilerParams(
            dimension_semantics=("parallel",)),
    )(x, w, b.reshape(1, N))


def _linear_add_ln_kernel(x_ref, w_ref, b_ref, r_ref, g_ref, bb_ref,
                          norm_ref, *, eps):
    y = jnp.dot(x_ref[...], w_ref[...], preferred_element_type=jnp.float32)
    s = y + b_ref[...] + r_ref[...].astype(jnp.float32)
    norm_ref[...] = _ln_math(s, g_ref[...], bb_ref[...], eps).astype(norm_ref.dtype)


def _linear_add_ln_both_kernel(x_ref, w_ref, b_ref, r_ref, g_ref, bb_ref,
                               sum_ref, norm_ref, *, eps):
    y = jnp.dot(x_ref[...], w_ref[...], preferred_element_type=jnp.float32)
    s = y + b_ref[...] + r_ref[...].astype(jnp.float32)
    sum_ref[...] = s.astype(sum_ref.dtype)
    norm_ref[...] = _ln_math(s, g_ref[...], bb_ref[...], eps).astype(norm_ref.dtype)


def pallas_linear_add_ln(x, w, b, r, gamma, beta, eps, return_sum=False):
    """Fused: s = (x @ w + b) + r ; out = LN(s).

    return_sum=False -> LN(s)
    return_sum=True  -> (s, LN(s))      (s is the new residual stream)
    """
    M, K = x.shape
    N = w.shape[1]
    TM = _row_tile(M)
    grid = (pl.cdiv(M, TM),)
    in_specs = [pl.BlockSpec((TM, K), lambda i: (i, 0)),
                pl.BlockSpec((K, N), lambda i: (0, 0)),
                pl.BlockSpec((1, N), lambda i: (0, 0)),
                pl.BlockSpec((TM, N), lambda i: (i, 0)),
                pl.BlockSpec((1, N), lambda i: (0, 0)),
                pl.BlockSpec((1, N), lambda i: (0, 0))]
    cp = pltpu.CompilerParams(dimension_semantics=("parallel",))
    args = (x, w, b.reshape(1, N), r, gamma.reshape(1, N), beta.reshape(1, N))
    if return_sum:
        return pl.pallas_call(
            functools.partial(_linear_add_ln_both_kernel, eps=eps),
            out_shape=(jax.ShapeDtypeStruct((M, N), x.dtype),
                       jax.ShapeDtypeStruct((M, N), x.dtype)),
            grid=grid, in_specs=in_specs,
            out_specs=(pl.BlockSpec((TM, N), lambda i: (i, 0)),
                       pl.BlockSpec((TM, N), lambda i: (i, 0))),
            compiler_params=cp,
        )(*args)
    return pl.pallas_call(
        functools.partial(_linear_add_ln_kernel, eps=eps),
        out_shape=jax.ShapeDtypeStruct((M, N), x.dtype),
        grid=grid, in_specs=in_specs,
        out_specs=pl.BlockSpec((TM, N), lambda i: (i, 0)),
        compiler_params=cp,
    )(*args)


def _layernorm_kernel(x_ref, g_ref, b_ref, o_ref, *, eps):
    x = x_ref[...].astype(jnp.float32)
    o_ref[...] = _ln_math(x, g_ref[...], b_ref[...], eps).astype(o_ref.dtype)


def pallas_layernorm(x, gamma, beta, eps=1e-6):
    """x: (M, D); gamma, beta: (D,)."""
    M, D = x.shape
    TM = _row_tile(M)
    grid = (pl.cdiv(M, TM),)
    return pl.pallas_call(
        functools.partial(_layernorm_kernel, eps=eps),
        out_shape=jax.ShapeDtypeStruct((M, D), x.dtype),
        grid=grid,
        in_specs=[pl.BlockSpec((TM, D), lambda i: (i, 0)),
                  pl.BlockSpec((1, D), lambda i: (0, 0)),
                  pl.BlockSpec((1, D), lambda i: (0, 0))],
        out_specs=pl.BlockSpec((TM, D), lambda i: (i, 0)),
        compiler_params=pltpu.CompilerParams(
            dimension_semantics=("parallel",)),
    )(x, gamma.reshape(1, D), beta.reshape(1, D))


def _add_ln_kernel(x_ref, r_ref, g_ref, b_ref, norm_ref, *, eps):
    s = x_ref[...].astype(jnp.float32) + r_ref[...].astype(jnp.float32)
    norm_ref[...] = _ln_math(s, g_ref[...], b_ref[...], eps).astype(norm_ref.dtype)


def pallas_add_layernorm(x, r, gamma, beta, eps):
    """Fused LN(x + r).  x, r: (M, D)."""
    M, D = x.shape
    TM = _row_tile(M)
    grid = (pl.cdiv(M, TM),)
    return pl.pallas_call(
        functools.partial(_add_ln_kernel, eps=eps),
        out_shape=jax.ShapeDtypeStruct((M, D), x.dtype),
        grid=grid,
        in_specs=[pl.BlockSpec((TM, D), lambda i: (i, 0)),
                  pl.BlockSpec((TM, D), lambda i: (i, 0)),
                  pl.BlockSpec((1, D), lambda i: (0, 0)),
                  pl.BlockSpec((1, D), lambda i: (0, 0))],
        out_specs=pl.BlockSpec((TM, D), lambda i: (i, 0)),
        compiler_params=pltpu.CompilerParams(
            dimension_semantics=("parallel",)),
    )(x, r, gamma.reshape(1, D), beta.reshape(1, D))


def _softmax_attn_head(q, k, v, scale):
    s = jax.lax.dot_general(q, k, (((1,), (1,)), ((), ())),
                            preferred_element_type=jnp.float32) * scale
    m = jnp.max(s, axis=-1, keepdims=True)
    p = jnp.exp(s - m)
    l = jnp.sum(p, axis=-1, keepdims=True)
    o = jnp.dot(p, v, preferred_element_type=jnp.float32)
    return o * pl.reciprocal(l, approx=True)


def _attn_self_kernel(qkv_ref, o_ref, *, num_heads, dh, scale):
    qkv = qkv_ref[0].astype(jnp.float32)          # (L, 3*D), one lane-dense load
    D = num_heads * dh
    outs = []
    for h in range(num_heads):                    # static unroll over heads
        q = qkv[:, h * dh:(h + 1) * dh]
        k = qkv[:, D + h * dh:D + (h + 1) * dh]
        v = qkv[:, 2 * D + h * dh:2 * D + (h + 1) * dh]
        outs.append(_softmax_attn_head(q, k, v, scale))
    o_ref[0] = jnp.concatenate(outs, axis=-1).astype(o_ref.dtype)  # one dense store


def _attn_cross_kernel(q_ref, kv_ref, o_ref, *, num_heads, dh, scale):
    qf = q_ref[0].astype(jnp.float32)             # (Lq, D)
    kv = kv_ref[0].astype(jnp.float32)            # (Lk, 2*D)
    D = num_heads * dh
    outs = []
    for h in range(num_heads):
        q = qf[:, h * dh:(h + 1) * dh]
        k = kv[:, h * dh:(h + 1) * dh]
        v = kv[:, D + h * dh:D + (h + 1) * dh]
        outs.append(_softmax_attn_head(q, k, v, scale))
    o_ref[0] = jnp.concatenate(outs, axis=-1).astype(o_ref.dtype)


def pallas_attn_self(qkv, num_heads, scale):
    """qkv: (B, L, 3*D) fused Q|K|V -> (B, L, D)."""
    B, L, D3 = qkv.shape
    D = D3 // 3
    dh = D // num_heads
    return pl.pallas_call(
        functools.partial(_attn_self_kernel, num_heads=num_heads, dh=dh, scale=scale),
        out_shape=jax.ShapeDtypeStruct((B, L, D), qkv.dtype),
        grid=(B,),
        in_specs=[pl.BlockSpec((1, L, D3), lambda b: (b, 0, 0))],
        out_specs=pl.BlockSpec((1, L, D), lambda b: (b, 0, 0)),
        compiler_params=pltpu.CompilerParams(
            dimension_semantics=("parallel",)),
    )(qkv)


def pallas_attn_cross(q, kv, num_heads, scale):
    """q: (B, Lq, D); kv: (B, Lk, 2*D) fused K|V -> (B, Lq, D)."""
    B, Lq, D = q.shape
    _, Lk, D2 = kv.shape
    dh = D // num_heads
    return pl.pallas_call(
        functools.partial(_attn_cross_kernel, num_heads=num_heads, dh=dh, scale=scale),
        out_shape=jax.ShapeDtypeStruct((B, Lq, D), q.dtype),
        grid=(B,),
        in_specs=[pl.BlockSpec((1, Lq, D), lambda b: (b, 0, 0)),
                  pl.BlockSpec((1, Lk, D2), lambda b: (b, 0, 0))],
        out_specs=pl.BlockSpec((1, Lq, D), lambda b: (b, 0, 0)),
        compiler_params=pltpu.CompilerParams(
            dimension_semantics=("parallel",)),
    )(q, kv)


def _qformer_input_kernel(x_ref, pos_ref, w_ref, b_ref, g1_ref, b1_ref,
                          g2_ref, b2_ref, qin_ref, ipos_ref, *, eps):
    # Fused: pos_proj matmul -> pos_ln -> (+pos) -> post_ln, plus (x + pos).
    x = x_ref[...].astype(jnp.float32)
    pos = pos_ref[...].astype(jnp.float32)
    y = jnp.dot(x, w_ref[...], preferred_element_type=jnp.float32) + b_ref[...]
    y = _ln_math(y, g1_ref[...], b1_ref[...], eps)
    y = y + pos
    y = _ln_math(y, g2_ref[...], b2_ref[...], eps)
    qin_ref[...] = y.astype(qin_ref.dtype)
    ipos_ref[...] = (x + pos).astype(ipos_ref.dtype)


def pallas_qformer_input(x, pos, pos_proj, pos_ln, post_ln, eps=1e-6):
    """x, pos: (M, D).  Returns (qformer_inputs, image_embed + pos)."""
    M, D = x.shape
    N = pos_proj["w"].shape[1]
    TM = _row_tile(M)
    grid = (pl.cdiv(M, TM),)
    return pl.pallas_call(
        functools.partial(_qformer_input_kernel, eps=eps),
        out_shape=(jax.ShapeDtypeStruct((M, N), x.dtype),
                   jax.ShapeDtypeStruct((M, D), x.dtype)),
        grid=grid,
        in_specs=[pl.BlockSpec((TM, D), lambda i: (i, 0)),
                  pl.BlockSpec((TM, D), lambda i: (i, 0)),
                  pl.BlockSpec((D, N), lambda i: (0, 0)),
                  pl.BlockSpec((1, N), lambda i: (0, 0)),
                  pl.BlockSpec((1, N), lambda i: (0, 0)),
                  pl.BlockSpec((1, N), lambda i: (0, 0)),
                  pl.BlockSpec((1, N), lambda i: (0, 0)),
                  pl.BlockSpec((1, N), lambda i: (0, 0))],
        out_specs=(pl.BlockSpec((TM, N), lambda i: (i, 0)),
                   pl.BlockSpec((TM, D), lambda i: (i, 0))),
        compiler_params=pltpu.CompilerParams(
            dimension_semantics=("parallel",)),
    )(x, pos, pos_proj["w"], pos_proj["b"].reshape(1, N),
      pos_ln["g"].reshape(1, N), pos_ln["b"].reshape(1, N),
      post_ln["g"].reshape(1, N), post_ln["b"].reshape(1, N))


# ----------------------------------------------------------------------------
# Composite blocks (glue around the Pallas kernels)
# ----------------------------------------------------------------------------

def mha_self_ctx(x, p, num_heads):
    """Fused-QKV projection + softmax attention; returns per-token context
    (B, L, D) *before* the output projection (caller fuses out-proj with the
    residual add + LayerNorm)."""
    B, L, Din = x.shape
    D3 = p["w_qkv"].shape[1]
    D = D3 // 3
    dh = D // num_heads
    qkv = pallas_linear(x.reshape(B * L, Din), p["w_qkv"], p["b_qkv"])
    return pallas_attn_self(qkv.reshape(B, L, D3), num_heads,
                            scale=1.0 / float(dh) ** 0.5)


def mha_cross_ctx(x_q, x_kv, p, num_heads):
    """Cross-attention (fused KV projection); returns context (B, Lq, D)
    before the output projection."""
    B, Lq, Dq = x_q.shape
    _, Lk, Dkv = x_kv.shape
    D = p["wq"].shape[1]
    dh = D // num_heads
    q = pallas_linear(x_q.reshape(B * Lq, Dq), p["wq"], p["bq"])
    kv = pallas_linear(x_kv.reshape(B * Lk, Dkv), p["w_kv"], p["b_kv"])
    return pallas_attn_cross(q.reshape(B, Lq, D), kv.reshape(B, Lk, 2 * D),
                             num_heads, scale=1.0 / float(dh) ** 0.5)


def get_1d_sincos_pos_embed_from_grid(embed_dim, pos):
    omega = np.arange(embed_dim // 2, dtype=np.float64)
    omega /= embed_dim / 2.0
    omega = 1.0 / 10000 ** omega
    out = np.einsum("m,d->md", pos.reshape(-1), omega)
    return np.concatenate([np.sin(out), np.cos(out)], axis=1)


def get_2d_sincos_pos_embed(embed_dim, grid_size, cls_token=False):
    grid_h = np.arange(grid_size, dtype=np.float32)
    grid_w = np.arange(grid_size, dtype=np.float32)
    grid = np.stack(np.meshgrid(grid_w, grid_h), axis=0).reshape(2, 1, grid_size, grid_size)
    emb_h = get_1d_sincos_pos_embed_from_grid(embed_dim // 2, grid[0])
    emb_w = get_1d_sincos_pos_embed_from_grid(embed_dim // 2, grid[1])
    pos = np.concatenate([emb_h, emb_w], axis=1)
    if cls_token:
        pos = np.concatenate([np.zeros([1, embed_dim]), pos], axis=0)
    return pos


def get_abs_pos(abs_pos, tgt_len):
    # TODO(synk): bicubic interpolation for mismatched grid sizes not implemented;
    # shapes are constructed to match so this is an identity.
    assert abs_pos.shape[0] == tgt_len
    return abs_pos


def vit_encoder(image, params, cfg):
    """Synthetic clip_vit_adapter_hf: returns (last_hidden_state (B,S,D),
    hidden_states: list of spatial (B, D, h, w) multiscale features).
    CLIP pixel normalization is already folded into patch_w / patch_b."""
    B, C, H, W = image.shape
    P = cfg["patch"]
    gh, gw = H // P, W // P
    D = cfg["d_enc"]
    # Patch-embedding conv (stride = kernel = P) as im2col + Pallas matmul.
    patches = image.reshape(B, C, gh, P, gw, P).transpose(0, 2, 4, 1, 3, 5)
    patches = patches.reshape(B * gh * gw, C * P * P)
    x = pallas_linear(patches, params["patch_w"], params["patch_b"])
    x = x.reshape(B, gh * gw, D)
    cls = jnp.broadcast_to(params["cls"], (B, 1, D))
    emb = jnp.concatenate([cls, x], axis=1)
    S = emb.shape[1]
    pos_t = jnp.tile(params["pos"], (B, 1))                       # (B*S, D)
    # fused (+pos) + pre-LN; in CLIP the pre-LN output IS the residual stream
    h = pallas_add_layernorm(emb.reshape(B * S, D), pos_t,
                             params["pre_ln"]["g"], params["pre_ln"]["b"],
                             eps=1e-5)
    layers = params["layers"]
    n_layers = len(layers)
    hn = pallas_layernorm(h, layers[0]["ln1"]["g"], layers[0]["ln1"]["b"], eps=1e-5)
    hidden_states = []
    last = h
    for i, lp in enumerate(layers):
        # attention block (pre-LN): h = h + proj(attn(LN1(h)))
        # out-proj + residual add + LN2 fused in one kernel.
        ctx = mha_self_ctx(hn.reshape(B, S, D), lp["attn"], cfg["n_heads"])
        h, hn2 = pallas_linear_add_ln(ctx.reshape(B * S, D),
                                      lp["attn"]["wo"], lp["attn"]["bo"], h,
                                      lp["ln2"]["g"], lp["ln2"]["b"],
                                      eps=1e-5, return_sum=True)
        # MLP block: h = h + fc2(quick_gelu(fc1(LN2(h))))
        inter = pallas_linear(hn2, lp["fc1"]["w"], lp["fc1"]["b"],
                              activation="quick_gelu")
        if i + 1 < n_layers:
            nxt = layers[i + 1]["ln1"]
            # fc2 + residual add + next layer's LN1 fused
            h, hn = pallas_linear_add_ln(inter, lp["fc2"]["w"], lp["fc2"]["b"], h,
                                         nxt["g"], nxt["b"],
                                         eps=1e-5, return_sum=True)
        else:
            # last layer: fc2 + residual add + encoder post-LN fused
            h, last = pallas_linear_add_ln(inter, lp["fc2"]["w"], lp["fc2"]["b"], h,
                                           params["post_ln"]["g"],
                                           params["post_ln"]["b"],
                                           eps=1e-5, return_sum=True)
        # multiscale spatial feature (drop cls token, NCHW)
        feat = h.reshape(B, S, D)[:, 1:, :].reshape(B, gh, gw, D).transpose(0, 3, 1, 2)
        hidden_states.append(feat)
    return last.reshape(B, S, D), hidden_states


def qformer_forward(query_embeds, enc_hidden, params, qcfg):
    """Blip2 QFormer (PerceiverResampler.blip2qformer), eval mode (no dropout)."""
    B, S, D = enc_hidden.shape
    Nq = query_embeds.shape[1]
    # LN(broadcast(q)) == broadcast(LN(q)); normalize once, then broadcast.
    hq = pallas_layernorm(query_embeds.reshape(Nq, D),
                          params["emb_ln"]["g"], params["emb_ln"]["b"], eps=1e-12)
    h = jnp.broadcast_to(hq[None], (B, Nq, D)).reshape(B * Nq, D)
    for li, lp in enumerate(params["layers"]):
        # self-attention, BERT-style post-LN: h = LN(proj(attn(h)) + h)
        ctx = mha_self_ctx(h.reshape(B, Nq, D), lp["self"], qcfg["n_heads"])
        h = pallas_linear_add_ln(ctx.reshape(B * Nq, D),
                                 lp["self"]["wo"], lp["self"]["bo"], h,
                                 lp["ln_self"]["g"], lp["ln_self"]["b"], eps=1e-12)
        # cross-attention to encoder hidden states
        if li % qcfg["cross_frequency"] == 0:
            cctx = mha_cross_ctx(h.reshape(B, Nq, D), enc_hidden, lp["cross"],
                                 qcfg["n_heads"])
            h = pallas_linear_add_ln(cctx.reshape(B * Nq, D),
                                     lp["cross"]["wo"], lp["cross"]["bo"], h,
                                     lp["ln_cross"]["g"], lp["ln_cross"]["b"],
                                     eps=1e-12)
        # feed-forward (query branch): h = LN(fc2(gelu(fc1(h))) + h)
        inter = pallas_linear(h, lp["fc1"]["w"], lp["fc1"]["b"], activation="gelu")
        h = pallas_linear_add_ln(inter, lp["fc2"]["w"], lp["fc2"]["b"], h,
                                 lp["ln_ffn"]["g"], lp["ln_ffn"]["b"], eps=1e-12)
    return h.reshape(B, Nq, D)


def visual_tokenizer_forward(image, params, cfg):
    # 1+2. CLIP pixel normalization is folded into the patch-embedding weights;
    #      run the CLIP-ViT encoder.
    image_embed, multiscale_features = vit_encoder(image, params["encoder"], cfg)
    B, S, D = image_embed.shape
    # 3. add 2d-sincos positional embeddings to multiscale features (outputs)
    # TODO(synk): tiny (B, C, 2, 2) NCHW elementwise add left to XLA (lane dim
    # too small for an efficient Pallas tile).
    ms_out = []
    for feat in multiscale_features:
        _, _, fh, fw = feat.shape
        pe = get_abs_pos(params["pos_embed"][1:], fh * fw)          # (h*w, C)
        pe = pe.reshape(fh, fw, D).transpose(2, 0, 1)[None]          # (1, C, h, w)
        ms_out.append(feat + pe)
    # 4. fused: pos_proj -> pos_ln -> (+pos_embed) -> post_ln, plus image_embed+pos
    pos_embed = get_abs_pos(params["pos_embed"], S)                  # (S, D)
    pos_t = jnp.tile(pos_embed, (B, 1))                              # (B*S, D)
    qin, image_embed_pos = pallas_qformer_input(
        image_embed.reshape(B * S, D), pos_t,
        params["pos_proj"], params["pos_ln"], params["post_ln"], eps=1e-6)
    # 5. PerceiverResampler (Blip2 QFormer over learned queries)
    vis = qformer_forward(params["queries"], qin.reshape(B, S, D),
                          params["qformer"], cfg["qformer"])
    # 6. projection to LLM hidden size
    Nq, Dq = vis.shape[1], vis.shape[2]
    vis_embed = pallas_linear(vis.reshape(B * Nq, Dq),
                              params["proj"]["w"], params["proj"]["b"])
    vis_embed = vis_embed.reshape(B, Nq, -1)
    return {"vis_embed": vis_embed,
            "image_embeds": image_embed_pos.reshape(B, S, D)[:, 1:, :],
            "multiscale_features": ms_out}


# ----------------------------------------------------------------------------
# Deterministic parameter construction (synthetic, no checkpoint loads)
# ----------------------------------------------------------------------------

def _dense(key, din, dout, scale=0.02):
    kw, kb = jax.random.split(key)
    return {"w": jax.random.normal(kw, (din, dout), jnp.float32) * scale,
            "b": jax.random.normal(kb, (dout,), jnp.float32) * scale}


def _ln(d):
    return {"g": jnp.ones((d,), jnp.float32), "b": jnp.zeros((d,), jnp.float32)}


def _mha_self_params(key, d_in, d_model, scale=0.02):
    k1, k2 = jax.random.split(key)
    p_qkv = _dense(k1, d_in, 3 * d_model, scale)     # fused Q|K|V
    p_o = _dense(k2, d_model, d_model, scale)
    return {"w_qkv": p_qkv["w"], "b_qkv": p_qkv["b"],
            "wo": p_o["w"], "bo": p_o["b"]}


def _mha_cross_params(key, d_q, d_kv, d_model, scale=0.02):
    k1, k2, k3 = jax.random.split(key, 3)
    pq = _dense(k1, d_q, d_model, scale)
    pkv = _dense(k2, d_kv, 2 * d_model, scale)       # fused K|V
    po = _dense(k3, d_model, d_model, scale)
    return {"wq": pq["w"], "bq": pq["b"],
            "w_kv": pkv["w"], "b_kv": pkv["b"],
            "wo": po["w"], "bo": po["b"]}


def build_params(key, cfg):
    d = cfg["d_enc"]
    P = cfg["patch"]
    gh = cfg["img"] // P
    n_tok = gh * gh + 1
    scale = 0.02
    keys = iter(jax.random.split(key, 64))

    clip_mean = jnp.array([0.48145466, 0.4578275, 0.40821073], jnp.float32)
    clip_std = jnp.array([0.26862954, 0.26130258, 0.27577711], jnp.float32)

    # Patch-embedding conv as matmul, with the per-channel (x-mean)/std affine
    # folded into the weights:  w' = w / std_c,  b' = b - (mean/std) . w
    patch = _dense(next(keys), 3 * P * P, d, scale)
    inv_std = 1.0 / clip_std                               # (3,)
    scale_k = jnp.repeat(inv_std, P * P)                   # (3*P*P,)  channel-major
    shift_k = jnp.repeat(clip_mean * inv_std, P * P)       # (3*P*P,)
    patch_w = patch["w"] * scale_k[:, None]
    patch_b = patch["b"] - shift_k @ patch["w"]

    enc_layers = []
    for _ in range(cfg["n_layers"]):
        enc_layers.append({
            "ln1": _ln(d),
            "attn": _mha_self_params(next(keys), d, d, scale),
            "ln2": _ln(d),
            "fc1": _dense(next(keys), d, cfg["d_mlp"], scale),
            "fc2": _dense(next(keys), cfg["d_mlp"], d, scale),
        })
    encoder = {
        "patch_w": patch_w,
        "patch_b": patch_b,
        "cls": jax.random.normal(next(keys), (1, d), jnp.float32) * scale,
        "pos": jax.random.normal(next(keys), (n_tok, d), jnp.float32) * scale,
        "pre_ln": _ln(d),
        "post_ln": _ln(d),
        "layers": enc_layers,
    }

    qcfg = cfg["qformer"]
    q_layers = []
    for _ in range(qcfg["n_layers"]):
        q_layers.append({
            "self": _mha_self_params(next(keys), d, d, scale),
            "ln_self": _ln(d),
            "cross": _mha_cross_params(next(keys), d, d, d, scale),
            "ln_cross": _ln(d),
            "fc1": _dense(next(keys), d, qcfg["d_inter"], scale),
            "fc2": _dense(next(keys), qcfg["d_inter"], d, scale),
            "ln_ffn": _ln(d),
        })

    pos_embed = jnp.asarray(get_2d_sincos_pos_embed(d, gh, cls_token=True),
                            jnp.float32)

    return {
        "clip_mean": clip_mean,
        "clip_std": clip_std,
        "encoder": encoder,
        "pos_proj": _dense(next(keys), d, d, scale),
        "pos_ln": _ln(d),
        "pos_embed": pos_embed,
        "post_ln": _ln(d),
        "queries": jax.random.normal(next(keys), (1, qcfg["num_queries"], d),
                                     jnp.float32) * scale,
        "qformer": {"emb_ln": _ln(d), "layers": q_layers},
        # TODO(synk): `proj` weights are synthetic (mm_projector.bin not loaded).
        "proj": _dense(next(keys), d, cfg["llm_hidden"], scale),
    }


# ----------------------------------------------------------------------------

if __name__ == "__main__":
    cfg = {
        "img": 32,            # square image H=W
        "patch": 16,          # -> 2x2 patch grid, 4 patch tokens + cls
        "d_enc": 64,          # encoder_hidden_size == qformer hidden_size
        "n_heads": 4,
        "n_layers": 2,
        "d_mlp": 128,
        "llm_hidden": 128,
        "qformer": {
            "num_queries": 8,
            "n_heads": 4,
            "n_layers": 2,
            "d_inter": 128,
            "cross_frequency": 1,
        },
    }
    key = jax.random.PRNGKey(0)
    pkey, ikey = jax.random.split(key)
    params = build_params(pkey, cfg)

    image = jax.random.normal(ikey, (2, 3, cfg["img"], cfg["img"]), jnp.float32)

    out = visual_tokenizer_forward(image, params, cfg)
    out = jax.block_until_ready(out)

    assert out["vis_embed"].shape == (2, 8, 128)
    assert out["image_embeds"].shape == (2, 4, 64)
    assert len(out["multiscale_features"]) == 2
    assert out["multiscale_features"][0].shape == (2, 64, 2, 2)
    print("KERNEL_OK")
</pallas_src>

<mosaic_0001>
module attributes {stable_mosaic.version = 11 : i64} {
  func.func @_linear_kernel(%arg0: i32, %arg1: memref<8x768xf32, #tpu.memory_space<vmem>>, %arg2: memref<768x64xf32, #tpu.memory_space<vmem>>, %arg3: memref<1x64xf32, #tpu.memory_space<vmem>>, %arg4: memref<8x64xf32, #tpu.memory_space<vmem>>) attributes {dimension_semantics = [#tpu.dimension_semantics<parallel>], iteration_bounds = array<i64: 1>, scalar_prefetch = 0 : i64, scratch_operands = 0 : i64, tpu.core_type = #tpu.core_type<tc>, window_params = [{transform_indices = @transform_0, window_bounds = array<i64: 8, 768>}, {pipeline_mode = #tpu.pipeline_mode<synchronous>, transform_indices = @transform_1, window_bounds = array<i64: 768, 64>}, {pipeline_mode = #tpu.pipeline_mode<synchronous>, transform_indices = @transform_2, window_bounds = array<i64: 1, 64>}, {transform_indices = @transform_3, window_bounds = array<i64: 8, 64>}]} {
    %c0 = arith.constant 0 : index
    %c0_0 = arith.constant 0 : index
    %0 = vector.load %arg1[%c0, %c0_0] : memref<8x768xf32, #tpu.memory_space<vmem>>, vector<8x768xf32>
    %c0_1 = arith.constant 0 : index
    %c0_2 = arith.constant 0 : index
    %1 = vector.load %arg2[%c0_1, %c0_2] : memref<768x64xf32, #tpu.memory_space<vmem>>, vector<768x64xf32>
    %cst = arith.constant dense<0.000000e+00> : vector<8x64xf32>
    %2 = tpu.matmul %0, %1, %cst {dimension_numbers = #tpu.dot_dimension_numbers<[1], [0], [0], [1], [0, 0, 1, 1], [], []>} : vector<8x768xf32>, vector<768x64xf32>, vector<8x64xf32> -> vector<8x64xf32>
    %c0_3 = arith.constant 0 : index
    %c0_4 = arith.constant 0 : index
    %3 = vector.load %arg3[%c0_3, %c0_4] : memref<1x64xf32, #tpu.memory_space<vmem>>, vector<1x64xf32>
    %4 = vector.broadcast %3 : vector<1x64xf32> to vector<8x64xf32>
    %5 = arith.addf %2, %4 : vector<8x64xf32>
    %c0_5 = arith.constant 0 : index
    %c0_6 = arith.constant 0 : index
    %6 = vector.load %arg4[%c0_5, %c0_6] : memref<8x64xf32, #tpu.memory_space<vmem>>, vector<8x64xf32>
    tpu.vector_store %arg4[%c0_5, %c0_6], %5 {strides = array<i32>} : memref<8x64xf32, #tpu.memory_space<vmem>>, vector<8x64xf32>,
    return
  }
  func.func @transform_0(%arg0: i32) -> (i32, i32) {
    %c0_i32 = arith.constant 0 : i32
    %c0_i32_0 = arith.constant 0 : i32
    return %arg0, %c0_i32 : i32, i32
  }
  func.func @transform_1(%arg0: i32) -> (i32, i32) {
    %c0_i32 = arith.constant 0 : i32
    %c0_i32_0 = arith.constant 0 : i32
    %c0_i32_1 = arith.constant 0 : i32
    return %c0_i32, %c0_i32_0 : i32, i32
  }
  func.func @transform_2(%arg0: i32) -> (i32, i32) {
    %c0_i32 = arith.constant 0 : i32
    %c0_i32_0 = arith.constant 0 : i32
    %c0_i32_1 = arith.constant 0 : i32
    return %c0_i32, %c0_i32_0 : i32, i32
  }
  func.func @transform_3(%arg0: i32) -> (i32, i32) {
    %c0_i32 = arith.constant 0 : i32
    %c0_i32_0 = arith.constant 0 : i32
    return %arg0, %c0_i32 : i32, i32
  }
}

</mosaic_0001>

<bundles_post_ra>
// kernel: tpu_custom_call.1
= control target key start
LH: loop header
LB: loop body
LE: loop exit
PB: predicated region body
PF: predicated region fallthrough
CT: control target
= control target key end

     0   :  { %s919_s0 = inlined_call_operand.vmem [shape: f32[8,768], index: 0, kind: input, shape index: {}]   ;;  %s920_s1 = inlined_call_operand.vmem [shape: f32[768,64], index: 1, kind: input, shape index: {}]   ;;  %s921_s2 = inlined_call_operand.vmem [shape: f32[1,64], index: 2, kind: input, shape index: {}]   ;;  %s922_s3 = inlined_call_operand.hbm [shape: f32[8,64], index: 3, kind: output, shape index: {}]  }
   0x1   :  { %v37_v0 = vld [vmem:[%s920_s1 + $0x80] sm:$0xff]  ;;  %v38_v1 = vld [vmem:[%s920_s1 + $0x88] sm:$0xff]  ;;  %v39_v11 = vld [vmem:[%s920_s1 + $0x90] sm:$0xff] }
   0x2   :  { %v21_v2 = vld [vmem:[%s920_s1] sm:$0xff]  ;;  %v456_v3 = vpack.c.bf16 %v38_v1, %v37_v0  ;;  %v22_v4 = vld [vmem:[%s920_s1 + $0x8] sm:$0xff]  ;;  %v40_v13 = vld [vmem:[%s920_s1 + $0x98] sm:$0xff] }
   0x3   :  { %v69_v5 = vld [vmem:[%s920_s1 + $0x180] sm:$0xff]  ;;  %v70_v6 = vld [vmem:[%s920_s1 + $0x188] sm:$0xff]  ;;  %v458_v7 = vpack.c.bf16 %v22_v4, %v21_v2  ;;  %v23_v14 = vld [vmem:[%s920_s1 + $0x10] sm:$0xff]  ;;  %v460_v16 = vpack.c.bf16 %v40_v13, %v39_v11 }
   0x4   :  { %v488_v8 = vpack.c.bf16 %v70_v6, %v69_v5  ;;  %v53_v9 = vld [vmem:[%s920_s1 + $0x100] sm:$0xff]  ;;  %v54_v10 = vld [vmem:[%s920_s1 + $0x108] sm:$0xff]  ;;  %457 = vmatprep.subr.bf16.mxu0 %v456_v3  ;;  %v24_v15 = vld [vmem:[%s920_s1 + $0x18] sm:$0xff] }
   0x5   :  { %v490_v12 = vpack.c.bf16 %v54_v10, %v53_v9  ;;  %459 = vmatpush3.bf16.msra.mxu0 %v458_v7  ;;  %v462_v17 = vpack.c.bf16 %v24_v15, %v23_v14  ;;  %v71_v18 = vld [vmem:[%s920_s1 + $0x190] sm:$0xff]  ;;  %v72_v19 = vld [vmem:[%s920_s1 + $0x198] sm:$0xff]  ;;  %v41_v23 = vld [vmem:[%s920_s1 + $0xa0] sm:$0xff] }
   0x6   :  { %489 = vmatprep.subr.bf16.mxu1 %v488_v8  ;;  %v55_v20 = vld [vmem:[%s920_s1 + $0x110] sm:$0xff]  ;;  %v492_v21 = vpack.c.bf16 %v72_v19, %v71_v18  ;;  %v56_v22 = vld [vmem:[%s920_s1 + $0x118] sm:$0xff]  ;;  %v42_v24 = vld [vmem:[%s920_s1 + $0xa8] sm:$0xff]  ;;  %461 = vmatprep.subr.bf16.mxu0 %v460_v16 }
   0x7   :  { %491 = vmatpush3.bf16.msra.mxu1 %v490_v12  ;;  %v494_v25 = vpack.c.bf16 %v56_v22, %v55_v20  ;;  %v464_v26 = vpack.c.bf16 %v42_v24, %v41_v23  ;;  %v25_v27 = vld [vmem:[%s920_s1 + $0x20] sm:$0xff]  ;;  %v26_v28 = vld [vmem:[%s920_s1 + $0x28] sm:$0xff]  ;;  %v43_v35 = vld [vmem:[%s920_s1 + $0xb0] sm:$0xff] }
   0x8   :  { %v73_v29 = vld [vmem:[%s920_s1 + $0x1a0] sm:$0xff]  ;;  %493 = vmatprep.subr.bf16.mxu1 %v492_v21  ;;  %v74_v30 = vld [vmem:[%s920_s1 + $0x1a8] sm:$0xff]  ;;  %v466_v33 = vpack.c.bf16 %v26_v28, %v25_v27  ;;  %v44_v36 = vld [vmem:[%s920_s1 + $0xb8] sm:$0xff] }
   0x9   :  { %v57_v31 = vld [vmem:[%s920_s1 + $0x120] sm:$0xff]  ;;  %v58_v32 = vld [vmem:[%s920_s1 + $0x128] sm:$0xff]  ;;  %463 = vmatpush3.bf16.msra.mxu0 %v462_v17  ;;  %v496_v34 = vpack.c.bf16 %v74_v30, %v73_v29  ;;  %v27_v37 = vld [vmem:[%s920_s1 + $0x30] sm:$0xff]  ;;  %v468_v39 = vpack.c.bf16 %v44_v36, %v43_v35 }
   0xa   :  { %465 = vmatprep.subr.bf16.mxu0 %v464_v26  ;;  %v498_v38 = vpack.c.bf16 %v58_v32, %v57_v31  ;;  %v28_v40 = vld [vmem:[%s920_s1 + $0x38] sm:$0xff]  ;;  %v75_v41 = vld [vmem:[%s920_s1 + $0x1b0] sm:$0xff]  ;;  %v45_v46 = vld [vmem:[%s920_s1 + $0xc0] sm:$0xff] }
   0xb   :  { %495 = vmatpush3.bf16.msra.mxu1 %v494_v25  ;;  %v76_v42 = vld [vmem:[%s920_s1 + $0x1b8] sm:$0xff]  ;;  %v59_v44 = vld [vmem:[%s920_s1 + $0x130] sm:$0xff]  ;;  %v46_v47 = vld [vmem:[%s920_s1 + $0xc8] sm:$0xff]  ;;  %v470_v48 = vpack.c.bf16 %v28_v40, %v27_v37 }
   0xc   :  { %497 = vmatprep.subr.bf16.mxu1 %v496_v34  ;;  %v500_v43 = vpack.c.bf16 %v76_v42, %v75_v41  ;;  %v60_v45 = vld [vmem:[%s920_s1 + $0x138] sm:$0xff]  ;;  %v77_v49 = vld [vmem:[%s920_s1 + $0x1c0] sm:$0xff]  ;;  %v78_v50 = vld [vmem:[%s920_s1 + $0x1c8] sm:$0xff]  ;;  %v472_v52 = vpack.c.bf16 %v46_v47, %v45_v46 }
   0xd   :  { %467 = vmatpush3.bf16.msra.mxu0 %v466_v33  ;;  %v502_v51 = vpack.c.bf16 %v60_v45, %v59_v44  ;;  %v29_v53 = vld [vmem:[%s920_s1 + $0x40] sm:$0xff]  ;;  %v30_v54 = vld [vmem:[%s920_s1 + $0x48] sm:$0xff]  ;;  %v504_v56 = vpack.c.bf16 %v78_v50, %v77_v49  ;;  %v47_v58 = vld [vmem:[%s920_s1 + $0xd0] sm:$0xff] }
   0xe   :  { %469 = vmatprep.subr.bf16.mxu0 %v468_v39  ;;  %v61_v55 = vld [vmem:[%s920_s1 + $0x140] sm:$0xff]  ;;  %v62_v57 = vld [vmem:[%s920_s1 + $0x148] sm:$0xff]  ;;  %v48_v59 = vld [vmem:[%s920_s1 + $0xd8] sm:$0xff]  ;;  %v474_v62 = vpack.c.bf16 %v30_v54, %v29_v53 }
   0xf   :  { %499 = vmatpush3.bf16.msra.mxu1 %v498_v38  ;;  %v79_v60 = vld [vmem:[%s920_s1 + $0x1d0] sm:$0xff]  ;;  %v80_v61 = vld [vmem:[%s920_s1 + $0x1d8] sm:$0xff]  ;;  %v506_v63 = vpack.c.bf16 %v62_v57, %v61_v55  ;;  %v476_v0 = vpack.c.bf16 %v48_v59, %v47_v58  ;;  %v49_v6 = vld [vmem:[%s920_s1 + $0xe0] sm:$0xff] }
  0x10   :  { %501 = vmatprep.subr.bf16.mxu1 %v500_v43  ;;  %v31_v1 = vld [vmem:[%s920_s1 + $0x50] sm:$0xff]  ;;  %v32_v2 = vld [vmem:[%s920_s1 + $0x58] sm:$0xff]  ;;  %v508_v4 = vpack.c.bf16 %v80_v61, %v79_v60  ;;  %v50_v7 = vld [vmem:[%s920_s1 + $0xe8] sm:$0xff] }
  0x11   :  { %471 = vmatpush3.bf16.msra.mxu0 %v470_v48  ;;  %v63_v3 = vld [vmem:[%s920_s1 + $0x150] sm:$0xff]  ;;  %v64_v5 = vld [vmem:[%s920_s1 + $0x158] sm:$0xff]  ;;  %v81_v8 = vld [vmem:[%s920_s1 + $0x1e0] sm:$0xff]  ;;  %v478_v10 = vpack.c.bf16 %v32_v2, %v31_v1  ;;  %v480_v14 = vpack.c.bf16 %v50_v7, %v49_v6 }
  0x12   :  { %473 = vmatprep.subr.bf16.mxu0 %v472_v52  ;;  %v82_v9 = vld [vmem:[%s920_s1 + $0x1e8] sm:$0xff]  ;;  %v33_v11 = vld [vmem:[%s920_s1 + $0x60] sm:$0xff]  ;;  %v510_v13 = vpack.c.bf16 %v64_v5, %v63_v3  ;;  %v51_v19 = vld [vmem:[%s920_s1 + $0xf0] sm:$0xff] }
  0x13   :  { %503 = vmatpush3.bf16.msra.mxu1 %v502_v51  ;;  %v16_v12 = vld [vmem:[%s919_s0 + $0x8] sm:$0xff]  ;;  %v65_v16 = vld [vmem:[%s920_s1 + $0x160] sm:$0xff]  ;;  %v512_v18 = vpack.c.bf16 %v82_v9, %v81_v8  ;;  %v52_v20 = vld [vmem:[%s920_s1 + $0xf8] sm:$0xff] }
  0x14   :  { %505 = vmatprep.subr.bf16.mxu1 %v504_v56  ;;  %v34_v15 = vld [vmem:[%s920_s1 + $0x68] sm:$0xff]  ;;  %188 = vmatprep.mubr.f32.mxu0 %v16_v12  ;;  %v18_v21 = vld [vmem:[%s919_s0 + $0x18] sm:$0xff]  ;;  %v83_v22 = vld [vmem:[%s920_s1 + $0x1f0] sm:$0xff]  ;;  %v484_v26 = vpack.c.bf16 %v52_v20, %v51_v19 }
  0x15   :  { %475 = vmatpush3.bf16.msra.mxu0 %v474_v62  ;;  %v66_v17 = vld [vmem:[%s920_s1 + $0x168] sm:$0xff]  ;;  %v84_v23 = vld [vmem:[%s920_s1 + $0x1f8] sm:$0xff]  ;;  %258 = vmatprep.mubr.f32.mxu1 %v18_v21  ;;  %v482_v24 = vpack.c.bf16 %v34_v15, %v33_v11  ;;  %v35_v27 = vld [vmem:[%s920_s1 + $0x70] sm:$0xff] }
  0x16   :  { %477 = vmatprep.subr.bf16.mxu0 %v476_v0  ;;  %v514_v25 = vpack.c.bf16 %v66_v17, %v65_v16  ;;  %v36_v28 = vld [vmem:[%s920_s1 + $0x78] sm:$0xff]  ;;  %v67_v29 = vld [vmem:[%s920_s1 + $0x170] sm:$0xff]  ;;  %v516_v30 = vpack.c.bf16 %v84_v23, %v83_v22  ;;  %v101_v32 = vld [vmem:[%s920_s1 + $0x280] sm:$0xff] }
  0x17   :  { %507 = vmatpush3.bf16.msra.mxu1 %v506_v63  ;;  %v68_v31 = vld [vmem:[%s920_s1 + $0x178] sm:$0xff]  ;;  %v102_v33 = vld [vmem:[%s920_s1 + $0x288] sm:$0xff]  ;;  %v486_v34 = vpack.c.bf16 %v36_v28, %v35_v27  ;;  %v85_v37 = vld [vmem:[%s920_s1 + $0x200] sm:$0xff] }
  0x18   :  { %509 = vmatprep.subr.bf16.mxu1 %v508_v4  ;;  %v518_v35 = vpack.c.bf16 %v68_v31, %v67_v29  ;;  %v520_v36 = vpack.c.bf16 %v102_v33, %v101_v32  ;;  %v86_v38 = vld [vmem:[%s920_s1 + $0x208] sm:$0xff]  ;;  %v103_v39 = vld [vmem:[%s920_s1 + $0x290] sm:$0xff]  ;;  %v104_v40 = vld [vmem:[%s920_s1 + $0x298] sm:$0xff] }
  0x19   :  { %479 = vmatpush3.bf16.msra.mxu0 %v478_v10  ;;  %v15_v41 = vld [vmem:[%s919_s0] sm:$0xff]  ;;  %v522_v42 = vpack.c.bf16 %v86_v38, %v85_v37  ;;  %v17_v43 = vld [vmem:[%s919_s0 + $0x10] sm:$0xff]  ;;  %v524_v44 = vpack.c.bf16 %v104_v40, %v103_v39  ;;  %v88_v46 = vld [vmem:[%s920_s1 + $0x218] sm:$0xff] }
  0x1a   :  { %481 = vmatprep.subr.bf16.mxu0 %v480_v14  ;;  %v87_v45 = vld [vmem:[%s920_s1 + $0x210] sm:$0xff]  ;;  %v105_v47 = vld [vmem:[%s920_s1 + $0x2a0] sm:$0xff]  ;;  %v106_v48 = vld [vmem:[%s920_s1 + $0x2a8] sm:$0xff] }
  0x1b   :  { %511 = vmatpush3.bf16.msra.mxu1 %v510_v13  ;;  %v20_v49 = vld [vmem:[%s919_s0 + $0x28] sm:$0xff] }
  0x1c   :  { %513 = vmatprep.subr.bf16.mxu1 %v512_v18 }
  0x1d   :  { %483 = vmatpush3.bf16.msra.mxu0 %v482_v24 }
  0x1e   :  { %485 = vmatprep.subr.bf16.mxu0 %v484_v26 }
  0x1f   :  { %515 = vmatpush3.bf16.msra.mxu1 %v514_v25 }
  0x20   :  { %517 = vmatprep.subr.bf16.mxu1 %v516_v30 }
  0x21   :  { %487 = vmatpush3.bf16.msra.mxu0 %v486_v34 }
  0x22   :  { %521 = vmatprep.subr.bf16.mxu0 %v520_v36 }
  0x23   :  { %519 = vmatpush3.bf16.msra.mxu1 %v518_v35 }
  0x24   :  { %8 = vsyncpa [#allocation3], 0  ;;  %189 = vmatmul.mubr.f32.vlgmr.msra.gmra.mrb[0].mxu0 %v15_v41  ;;  %v526_v50 = vpack.c.bf16 %v88_v46, %v87_v45  ;;  %v528_v51 = vpack.c.bf16 %v106_v48, %v105_v47  ;;  %v89_v52 = vld [vmem:[%s920_s1 + $0x220] sm:$0xff]  ;;  %v90_v53 = vld [vmem:[%s920_s1 + $0x228] sm:$0xff]  ;;  %vm334_vm0 = vcmask 523264  }
  0x25   :  { %523 = vmatpush3.bf16.msra.mxu0 %v522_v42  ;;  %328 = vmatprep.mubr.f32.mxu0 %v20_v49  ;;  %v107_v54 = vld [vmem:[%s920_s1 + $0x2b0] sm:$0xff]  ;;  %v108_v55 = vld [vmem:[%s920_s1 + $0x2b8] sm:$0xff]  ;;  %v530_v56 = vpack.c.bf16 %v90_v53, %v89_v52  ;;  %v109_v60 = vld [vmem:[%s920_s1 + $0x2c0] sm:$0xff] }
  0x26   :  { %259 = vmatmul.mubr.f32.vlgmr.msra.gmra.mrb[0].mxu1 %v17_v43  ;;  %525 = vmatprep.subr.bf16.mxu0 %v524_v44  ;;  %v532_v57 = vpack.c.bf16 %v108_v55, %v107_v54  ;;  %v91_v58 = vld [vmem:[%s920_s1 + $0x230] sm:$0xff]  ;;  %v92_v59 = vld [vmem:[%s920_s1 + $0x238] sm:$0xff]  ;;  %v110_v61 = vld [vmem:[%s920_s1 + $0x2c8] sm:$0xff] }
  0x27   :  { %v534_v62 = vpack.c.bf16 %v92_v59, %v91_v58  ;;  %v536_v63 = vpack.c.bf16 %v110_v61, %v109_v60  ;;  %v93_v0 = vld [vmem:[%s920_s1 + $0x240] sm:$0xff]  ;;  %v94_v1 = vld [vmem:[%s920_s1 + $0x248] sm:$0xff]  ;;  %v111_v2 = vld [vmem:[%s920_s1 + $0x2d0] sm:$0xff] }
  0x28   :  { %v112_v3 = vld [vmem:[%s920_s1 + $0x2d8] sm:$0xff]  ;;  %v538_v4 = vpack.c.bf16 %v94_v1, %v93_v0  ;;  %v95_v6 = vld [vmem:[%s920_s1 + $0x250] sm:$0xff]  ;;  %v113_v8 = vld [vmem:[%s920_s1 + $0x2e0] sm:$0xff] }
  0x29   :  { %527 = vmatpush3.bf16.msra.mxu0 %v526_v50  ;;  %v540_v5 = vpack.c.bf16 %v112_v3, %v111_v2  ;;  %v96_v7 = vld [vmem:[%s920_s1 + $0x258] sm:$0xff]  ;;  %v114_v9 = vld [vmem:[%s920_s1 + $0x2e8] sm:$0xff]  ;;  %v97_v12 = vld [vmem:[%s920_s1 + $0x260] sm:$0xff] }
  0x2a   :  { %529 = vmatprep.subr.bf16.mxu0 %v528_v51  ;;  %v542_v10 = vpack.c.bf16 %v96_v7, %v95_v6  ;;  %v544_v11 = vpack.c.bf16 %v114_v9, %v113_v8  ;;  %v98_v13 = vld [vmem:[%s920_s1 + $0x268] sm:$0xff]  ;;  %v115_v14 = vld [vmem:[%s920_s1 + $0x2f0] sm:$0xff]  ;;  %v116_v15 = vld [vmem:[%s920_s1 + $0x2f8] sm:$0xff] }
  0x2b   :  { %v546_v16 = vpack.c.bf16 %v98_v13, %v97_v12  ;;  %v548_v17 = vpack.c.bf16 %v116_v15, %v115_v14  ;;  %v99_v18 = vld [vmem:[%s920_s1 + $0x270] sm:$0xff]  ;;  %v100_v19 = vld [vmem:[%s920_s1 + $0x278] sm:$0xff]  ;;  %v19_v21 = vld [vmem:[%s919_s0 + $0x20] sm:$0xff]  ;;  %s577_s1 = smov [#allocation2]  }
  0x2c   :  { %v550_v20 = vpack.c.bf16 %v100_v19, %v99_v18  ;;  %v350_v23 = vld [vmem:[%s921_s2] ss:$0 sm:$0xff]  ;;  %s342_s29 = sshll.u32 %s577_s1, 4  ;;  %s343_s29 = int_to_ptr.vmem [resolvable:$true] %s342_s29 }
  0x2d   :  { %531 = vmatpush3.bf16.msra.mxu0 %v530_v56  ;;  %s553_s0 = scalar_lea.vmem %s343_s29, 128  ;;  %p558_p1 = scmp.lt.s32.totalorder %s343_s29, %s343_s29 }
  0x2e   :  { %533 = vmatprep.subr.bf16.mxu0 %v532_v57  ;;  %p554_p0 = scmp.ne.s32.totalorder %s343_s29, %s553_s0  ;;  %p559_p2 = scmp.lt.s32.totalorder %s553_s0, %s553_s0 }
  0x30   :  { %p560_p3 = por %p559_p2, %p558_p1 }
  0x31   :  { %535 = vmatpush3.bf16.msra.mxu0 %v534_v62 }
  0x32   :  { %537 = vmatprep.subr.bf16.mxu0 %v536_v63  ;;  %p561_p4 = pnand %p560_p3, %p554_p0 }
  0x35   :  { %539 = vmatpush3.bf16.msra.mxu0 %v538_v4 }
  0x36   :  { %541 = vmatprep.subr.bf16.mxu0 %v540_v5 }
  0x39   :  { %543 = vmatpush3.bf16.msra.mxu0 %v542_v10 }
  0x3a   :  { %545 = vmatprep.subr.bf16.mxu0 %v544_v11 }
  0x3d   :  { %547 = vmatpush3.bf16.msra.mxu0 %v546_v16 }
  0x3e   :  { %549 = vmatprep.subr.bf16.mxu0 %v548_v17 }
  0x41   :  { %551 = vmatpush3.bf16.msra.mxu0 %v550_v20 }
  0x44   :  { %329 = vmatmul.mubr.f32.vlgmr.msra.gmra.mrb[2].mxu0 %v19_v21 }
  0xf7   :  { %v383_v22 = vpop.f32.mrb[0].mxu0 }
  0xf8   :  { %v384_v24 = vpop.f32.mrb[1].mxu0 }
  0xf9   :  { %v418_v25 = vpop.f32.mrb[0].mxu1  ;;  %v385_v26 = vadd.f32 %v384_v24, %v383_v22 }
  0xfa   :  { %v419_v27 = vpop.f32.mrb[1].mxu1 }
  0xfb   :  { %v420_v28 = vadd.f32 %v419_v27, %v418_v25  ;;  %v191_v29 = vadd.f32 %v385_v26, %v350_v23 }
  0xfd   :  { %v261_v30 = vadd.f32 %v420_v28, %v191_v29 }
 0x117   :  { %v453_v31 = vpop.f32.mrb[2].mxu0 }
 0x118   :  { %v454_v32 = vpop.f32.mrb[3].mxu0 }
 0x119   :  { %v455_v33 = vadd.f32 %v454_v32, %v453_v31 }
 0x11b   :  { %v331_v34 = vadd.f32 %v455_v33, %v261_v30 }
 0x11d   :  { %335 = vst.msk [vmem:[#allocation2] sm:$0xff] %vm334_vm0, %v331_v34 }
 0x11e   :  { %564 = shalt.err (!%p561_p4)
}
 0x11f   :  { %s565_s4 = scalar_lea.hbm %s922_s3, 128 }
 0x120   :  { %p566_p5 = scmp.ne.s32.totalorder %s922_s3, %s565_s4  ;;  %p569_p6 = scmp.lt.u32.totalorder %s565_s4, %s922_s3 }
 0x122   :  { %p571_p7 = pnand %p569_p6, %p566_p5 }
 0x124   :  { %574 = shalt.err (!%p571_p7)
}
 0x125   :  { %345 = dma.vmem_to_hbm [thread:$0]  %s343_s29, 128, %s922_s3, [#allocation3]  }
 0x126   :  { %575 = dma.done.wait [#allocation3], 128  }
 0x127   :  { %576 = vsyncadd [#allocation3], 4294967168 }
 0x128   :  { %349 = vsyncpa [#allocation3], 1 }

</bundles_post_ra>
